<compile_context>
chip_gen: v5e
topology: v5e:2x2
jax: 0.10.0
libtpu: 0.0.40
codegen_flags: <defaults>
</compile_context>

<pallas_src>
import functools

import jax
import jax.numpy as jnp
from jax.experimental import pallas as pl
from jax.experimental.pallas import tpu as pltpu


def _round_up(x: int, m: int) -> int:
    return ((x + m - 1) // m) * m


def _cdiv(a: int, b: int) -> int:
    return (a + b - 1) // b


def _fused_mlp_kernel(*refs, n_layers: int, out_features: int):
    """refs = (x_ref, w0_ref, b0_ref, w1_ref, b1_ref, ..., o_ref).

    Computes relu(...relu(x @ W0 + b0)...) @ W_last + b_last entirely in
    vregs/VMEM.  Weights are pre-transposed (in, out_pad); biases (1, out_pad)
    stay f32.  Only the true out_features columns are stored (lane mask on the
    store, but the HBM destination is narrow + contiguous)."""
    x_ref, o_ref = refs[0], refs[-1]
    h = x_ref[...]
    for l in range(n_layers):
        wT_ref = refs[1 + 2 * l]
        b_ref = refs[2 + 2 * l]
        lhs = h.astype(wT_ref.dtype)          # no-op for f32; bf16 MXU path if bf16
        h = jnp.dot(lhs, wT_ref[...], preferred_element_type=jnp.float32)
        h = h + b_ref[...]                    # (1, out_pad) broadcasts over rows, f32
        if l < n_layers - 1:
            h = jnp.maximum(h, 0.0)           # ReLU on all but last layer
    o_ref[...] = h[:, :out_features].astype(o_ref.dtype)


def init_dqnetwork_params(key, layers):
    """Matches the PyTorch module: weights xavier_uniform_ with shape (out, in);
    biases PyTorch Linear default uniform(-1/sqrt(fan_in), 1/sqrt(fan_in))."""
    params = []
    for in_f, out_f in zip(layers, layers[1:]):
        key, kw, kb = jax.random.split(key, 3)
        bound_w = jnp.sqrt(6.0 / (in_f + out_f))
        w = jax.random.uniform(kw, (out_f, in_f), jnp.float32, -bound_w, bound_w)
        bound_b = 1.0 / jnp.sqrt(float(in_f))
        b = jax.random.uniform(kb, (out_f,), jnp.float32, -bound_b, bound_b)
        params.append((w, b))
    return params


def prepare_fused_params(params, weight_dtype=jnp.float32):
    """One-time prep: transpose weights to (in, out) and zero-pad feature dims to
    multiples of 128 (lane-dense intermediates).  Layer 0 keeps the true input
    width; later layers' input width equals the previous padded output width.
    Zero padding keeps the math exact.  Weights may be stored as bf16 for the
    MXU-native path; biases stay f32."""
    fused = []
    prev_out_pad = None
    for l, (w, b) in enumerate(params):
        out_f, in_f = w.shape
        out_pad = _round_up(out_f, 128)
        in_dim = in_f if l == 0 else prev_out_pad
        wT = jnp.zeros((in_dim, out_pad), jnp.float32).at[:in_f, :out_f].set(w.T)
        wT = wT.astype(weight_dtype)
        b_p = jnp.zeros((1, out_pad), jnp.float32).at[0, :out_f].set(b)
        fused.append((wT, b_p))
        prev_out_pad = out_pad
    out_features = params[-1][0].shape[0]
    return fused, out_features


def dqnetwork_forward(fused_params, x, out_features, *, tile_cap=1024):
    """Fused forward pass. x: (B, in_features) f32. Returns (B, out_features)."""
    B, in_f = x.shape
    n_layers = len(fused_params)

    # Balanced batch tiling (amortize ~0.35us/step); even #tiles for v7x's 2 TCs.
    if B >= 128:
        num_tiles = 2 * _cdiv(B, 2 * tile_cap)
    else:
        num_tiles = 1
    tile_b = _round_up(_cdiv(B, num_tiles), 8)
    b_pad = num_tiles * tile_b
    x_p = x if b_pad == B else jnp.pad(x, ((0, b_pad - B), (0, 0)))

    operands = [x_p]
    in_specs = [pl.BlockSpec((tile_b, in_f), lambda i: (i, 0))]
    for wT, bp in fused_params:
        operands.append(wT)
        operands.append(bp)
        # Whole array resident in VMEM once (single-buffered, no per-step DMA).
        in_specs.append(pl.BlockSpec(memory_space=pltpu.MemorySpace.VMEM))
        in_specs.append(pl.BlockSpec(memory_space=pltpu.MemorySpace.VMEM))

    flops = 2 * b_pad * sum(wT.shape[0] * wT.shape[1] for wT, _ in fused_params)
    bytes_accessed = (
        x_p.size * x_p.dtype.itemsize
        + sum(wT.size * wT.dtype.itemsize + bp.size * bp.dtype.itemsize
              for wT, bp in fused_params)
        + b_pad * out_features * x.dtype.itemsize)

    kernel = functools.partial(_fused_mlp_kernel, n_layers=n_layers,
                               out_features=out_features)
    out = pl.pallas_call(
        kernel,
        out_shape=jax.ShapeDtypeStruct((b_pad, out_features), x.dtype),
        grid=(num_tiles,),
        in_specs=in_specs,
        # Last dim == full array dim -> legal narrow block; no padded slab write.
        out_specs=pl.BlockSpec((tile_b, out_features), lambda i: (i, 0)),
        compiler_params=pltpu.CompilerParams(
            dimension_semantics=("parallel",),
            vmem_limit_bytes=32 * 1024 * 1024),
        cost_estimate=pl.CostEstimate(flops=flops, transcendentals=0,
                                      bytes_accessed=bytes_accessed),
    )(*operands)
    return out[:B] if b_pad != B else out


def dqnetwork_reference(params, x):
    n = len(params)
    for i, (w, b) in enumerate(params):
        x = x @ w.T + b
        if i < n - 1:
            x = jnp.maximum(x, 0.0)
    return x


if __name__ == "__main__":
    key = jax.random.PRNGKey(0)
    layers = [16, 32, 32, 4]          # DQNetwork(Layers=[16, 32, 32, 4])

    key, kx = jax.random.split(key)
    params = init_dqnetwork_params(key, layers)
    fused_f32, out_features = prepare_fused_params(params)

    # Small eval-style batch (single tile), exact f32 path.
    x_small = jax.random.normal(kx, (8, layers[0]), jnp.float32)
    out = jax.block_until_ready(dqnetwork_forward(fused_f32, x_small, out_features))
    ref = dqnetwork_reference(params, x_small)
    assert out.shape == (8, layers[-1])
    assert jnp.allclose(out, ref, atol=1e-5, rtol=1e-5)

    # Larger training-style batch: multi-tile grid + row padding path.
    key, kx2 = jax.random.split(key)
    x_big = jax.random.normal(kx2, (200, layers[0]), jnp.float32)
    out_big = jax.block_until_ready(dqnetwork_forward(fused_f32, x_big, out_features))
    ref_big = dqnetwork_reference(params, x_big)
    assert out_big.shape == (200, layers[-1])
    assert jnp.allclose(out_big, ref_big, atol=1e-5, rtol=1e-5)

    # bf16-weight MXU-native path (matters when hidden sizes scale up).
    fused_bf16, _ = prepare_fused_params(params, weight_dtype=jnp.bfloat16)
    out_bf16 = jax.block_until_ready(dqnetwork_forward(fused_bf16, x_big, out_features))
    assert out_bf16.shape == (200, layers[-1])
    assert jnp.allclose(out_bf16, ref_big, atol=2e-1, rtol=1e-1)

    print("KERNEL_OK")
</pallas_src>

<mosaic_0001>
module attributes {stable_mosaic.version = 11 : i64} {
  func.func @_fused_mlp_kernel(%arg0: i32, %arg1: memref<8x16xf32, #tpu.memory_space<vmem>>, %arg2: memref<16x128xf32, #tpu.memory_space<vmem>>, %arg3: memref<1x128xf32, #tpu.memory_space<vmem>>, %arg4: memref<128x128xf32, #tpu.memory_space<vmem>>, %arg5: memref<1x128xf32, #tpu.memory_space<vmem>>, %arg6: memref<128x128xf32, #tpu.memory_space<vmem>>, %arg7: memref<1x128xf32, #tpu.memory_space<vmem>>, %arg8: memref<8x4xf32, #tpu.memory_space<vmem>>) attributes {dimension_semantics = [#tpu.dimension_semantics<parallel>], iteration_bounds = array<i64: 1>, scalar_prefetch = 0 : i64, scratch_operands = 0 : i64, tpu.core_type = #tpu.core_type<tc>, window_params = [{transform_indices = @transform_0, window_bounds = array<i64: 8, 16>}, {pipeline_mode = #tpu.pipeline_mode<synchronous>, transform_indices = @transform_1, window_bounds = array<i64: 16, 128>}, {pipeline_mode = #tpu.pipeline_mode<synchronous>, transform_indices = @transform_2, window_bounds = array<i64: 1, 128>}, {pipeline_mode = #tpu.pipeline_mode<synchronous>, transform_indices = @transform_3, window_bounds = array<i64: 128, 128>}, {pipeline_mode = #tpu.pipeline_mode<synchronous>, transform_indices = @transform_4, window_bounds = array<i64: 1, 128>}, {pipeline_mode = #tpu.pipeline_mode<synchronous>, transform_indices = @transform_5, window_bounds = array<i64: 128, 128>}, {pipeline_mode = #tpu.pipeline_mode<synchronous>, transform_indices = @transform_6, window_bounds = array<i64: 1, 128>}, {transform_indices = @transform_7, window_bounds = array<i64: 8, 4>}]} {
    %c0 = arith.constant 0 : index
    %c0_0 = arith.constant 0 : index
    %0 = vector.load %arg1[%c0, %c0_0] : memref<8x16xf32, #tpu.memory_space<vmem>>, vector<8x16xf32>
    %c0_1 = arith.constant 0 : index
    %c0_2 = arith.constant 0 : index
    %1 = vector.load %arg2[%c0_1, %c0_2] : memref<16x128xf32, #tpu.memory_space<vmem>>, vector<16x128xf32>
    %cst = arith.constant dense<0.000000e+00> : vector<8x128xf32>
    %2 = tpu.matmul %0, %1, %cst {dimension_numbers = #tpu.dot_dimension_numbers<[1], [0], [0], [1], [0, 0, 1, 1], [], []>} : vector<8x16xf32>, vector<16x128xf32>, vector<8x128xf32> -> vector<8x128xf32>
    %c0_3 = arith.constant 0 : index
    %c0_4 = arith.constant 0 : index
    %3 = vector.load %arg3[%c0_3, %c0_4] : memref<1x128xf32, #tpu.memory_space<vmem>>, vector<1x128xf32>
    %4 = vector.broadcast %3 : vector<1x128xf32> to vector<8x128xf32>
    %5 = arith.addf %2, %4 : vector<8x128xf32>
    %cst_5 = arith.constant 0.000000e+00 : f32
    %6 = vector.broadcast %cst_5 : f32 to vector<8x128xf32>
    %7 = arith.maximumf %5, %6 : vector<8x128xf32>
    %c0_6 = arith.constant 0 : index
    %c0_7 = arith.constant 0 : index
    %8 = vector.load %arg4[%c0_6, %c0_7] : memref<128x128xf32, #tpu.memory_space<vmem>>, vector<128x128xf32>
    %cst_8 = arith.constant dense<0.000000e+00> : vector<8x128xf32>
    %9 = tpu.matmul %7, %8, %cst_8 {dimension_numbers = #tpu.dot_dimension_numbers<[1], [0], [0], [1], [0, 0, 1, 1], [], []>} : vector<8x128xf32>, vector<128x128xf32>, vector<8x128xf32> -> vector<8x128xf32>
    %c0_9 = arith.constant 0 : index
    %c0_10 = arith.constant 0 : index
    %10 = vector.load %arg5[%c0_9, %c0_10] : memref<1x128xf32, #tpu.memory_space<vmem>>, vector<1x128xf32>
    %11 = vector.broadcast %10 : vector<1x128xf32> to vector<8x128xf32>
    %12 = arith.addf %9, %11 : vector<8x128xf32>
    %cst_11 = arith.constant 0.000000e+00 : f32
    %13 = vector.broadcast %cst_11 : f32 to vector<8x128xf32>
    %14 = arith.maximumf %12, %13 : vector<8x128xf32>
    %c0_12 = arith.constant 0 : index
    %c0_13 = arith.constant 0 : index
    %15 = vector.load %arg6[%c0_12, %c0_13] : memref<128x128xf32, #tpu.memory_space<vmem>>, vector<128x128xf32>
    %cst_14 = arith.constant dense<0.000000e+00> : vector<8x128xf32>
    %16 = tpu.matmul %14, %15, %cst_14 {dimension_numbers = #tpu.dot_dimension_numbers<[1], [0], [0], [1], [0, 0, 1, 1], [], []>} : vector<8x128xf32>, vector<128x128xf32>, vector<8x128xf32> -> vector<8x128xf32>
    %c0_15 = arith.constant 0 : index
    %c0_16 = arith.constant 0 : index
    %17 = vector.load %arg7[%c0_15, %c0_16] : memref<1x128xf32, #tpu.memory_space<vmem>>, vector<1x128xf32>
    %18 = vector.broadcast %17 : vector<1x128xf32> to vector<8x128xf32>
    %19 = arith.addf %16, %18 : vector<8x128xf32>
    %20 = vector.extract_strided_slice %19 {offsets = [0, 0], sizes = [8, 4], strides = [1, 1]} : vector<8x128xf32> to vector<8x4xf32>
    %c0_17 = arith.constant 0 : index
    %c0_18 = arith.constant 0 : index
    %21 = vector.load %arg8[%c0_17, %c0_18] : memref<8x4xf32, #tpu.memory_space<vmem>>, vector<8x4xf32>
    tpu.vector_store %arg8[%c0_17, %c0_18], %20 {strides = array<i32>} : memref<8x4xf32, #tpu.memory_space<vmem>>, vector<8x4xf32>,
    return
  }
  func.func @transform_0(%arg0: i32) -> (i32, i32) {
    %c0_i32 = arith.constant 0 : i32
    %c0_i32_0 = arith.constant 0 : i32
    return %arg0, %c0_i32 : i32, i32
  }
  func.func @transform_1(%arg0: i32) -> (i32, i32) {
    %c0_i32 = arith.constant 0 : i32
    %c0_i32_0 = arith.constant 0 : i32
    %c0_i32_1 = arith.constant 0 : i32
    return %c0_i32, %c0_i32_0 : i32, i32
  }
  func.func @transform_2(%arg0: i32) -> (i32, i32) {
    %c0_i32 = arith.constant 0 : i32
    %c0_i32_0 = arith.constant 0 : i32
    %c0_i32_1 = arith.constant 0 : i32
    return %c0_i32, %c0_i32_0 : i32, i32
  }
  func.func @transform_3(%arg0: i32) -> (i32, i32) {
    %c0_i32 = arith.constant 0 : i32
    %c0_i32_0 = arith.constant 0 : i32
    %c0_i32_1 = arith.constant 0 : i32
    return %c0_i32, %c0_i32_0 : i32, i32
  }
  func.func @transform_4(%arg0: i32) -> (i32, i32) {
    %c0_i32 = arith.constant 0 : i32
    %c0_i32_0 = arith.constant 0 : i32
    %c0_i32_1 = arith.constant 0 : i32
    return %c0_i32, %c0_i32_0 : i32, i32
  }
  func.func @transform_5(%arg0: i32) -> (i32, i32) {
    %c0_i32 = arith.constant 0 : i32
    %c0_i32_0 = arith.constant 0 : i32
    %c0_i32_1 = arith.constant 0 : i32
    return %c0_i32, %c0_i32_0 : i32, i32
  }
  func.func @transform_6(%arg0: i32) -> (i32, i32) {
    %c0_i32 = arith.constant 0 : i32
    %c0_i32_0 = arith.constant 0 : i32
    %c0_i32_1 = arith.constant 0 : i32
    return %c0_i32, %c0_i32_0 : i32, i32
  }
  func.func @transform_7(%arg0: i32) -> (i32, i32) {
    %c0_i32 = arith.constant 0 : i32
    %c0_i32_0 = arith.constant 0 : i32
    return %arg0, %c0_i32 : i32, i32
  }
}

</mosaic_0001>

<bundles_post_ra>
// kernel: tpu_custom_call.1
= control target key start
LH: loop header
LB: loop body
LE: loop exit
PB: predicated region body
PF: predicated region fallthrough
CT: control target
= control target key end

     0   :  { %12 = vsyncpa [#allocation3], 0  ;;  %s391_s0 = inlined_call_operand.hbm [shape: f32[8,16], index: 0, kind: input, shape index: {}]   ;;  %s392_s1 = inlined_call_operand.hbm [shape: f32[16,128], index: 1, kind: input, shape index: {}]   ;;  %s393_s2 = inlined_call_operand.vmem [shape: f32[1,128], index: 2, kind: input, shape index: {}]   ;;  %s394_s3 = inlined_call_operand.hbm [shape: f32[128,128], index: 3, kind: input, shape index: {}]   ;;  %s395_s4 = inlined_call_operand.vmem [shape: f32[1,128], index: 4, kind: input, shape index: {}]   ;;  %s396_s5 = inlined_call_operand.hbm [shape: f32[128,128], index: 5, kind: input, shape index: {}]   ;;  %s397_s6 = inlined_call_operand.vmem [shape: f32[1,128], index: 6, kind: input, shape index: {}]   ;;  %s398_s7 = inlined_call_operand.vmem [shape: f32[8,4], index: 7, kind: output, shape index: {}]  }
   0x1   :  { %13 = vsyncpa [#allocation5], 0  ;;  %s30_s26 = sshll.u32 %s392_s1, 4  ;;  %s31_s26 = int_to_ptr.hbm [resolvable:$true] %s30_s26 }
   0x2   :  { %14 = vsyncpa [#allocation8], 0  ;;  %s321_s27 = smov [#allocation4]   ;;  %s20_s8 = sshll.u32 %s391_s0, 4  ;;  %s21_s8 = int_to_ptr.hbm [resolvable:$true] %s20_s8 }
   0x3   :  { %s32_s28 = sshll.u32 %s321_s27, 4  ;;  %s322_s9 = smov 128   ;;  %s33_s28 = int_to_ptr.vmem [resolvable:$true] %s32_s28 }
   0x4   :  { %s323_s10 = smov 8   ;;  %s324_s11 = smov [#allocation2]  }
   0x5   :  { %38 = dma.hbm_to_vmem [thread:$0]  %s31_s26, 256, %s33_s28, [#allocation5], %s322_s9, %s322_s9, %s323_s10  }
   0x6   :  { %s22_s12 = sshll.u32 %s324_s11, 4  ;;  %s45_s15 = sshll.u32 %s394_s3, 4  ;;  %s23_s12 = int_to_ptr.vmem [resolvable:$true] %s22_s12  ;;  %s46_s15 = int_to_ptr.hbm [resolvable:$true] %s45_s15 }
   0x7   :  { %25 = dma.hbm_to_vmem [thread:$0]  %s21_s8, 128, %s23_s12, [#allocation3]  }
   0x8   :  { %s60_s17 = sshll.u32 %s396_s5, 4  ;;  %s325_s18 = smov [#allocation6]   ;;  %s61_s17 = int_to_ptr.hbm [resolvable:$true] %s60_s17 }
   0x9   :  { %s47_s19 = sshll.u32 %s325_s18, 4  ;;  %s326_s0 = smov [#allocation7]   ;;  %s48_s19 = int_to_ptr.vmem [resolvable:$true] %s47_s19 }
   0xa   :  { %53 = dma.hbm_to_vmem [thread:$0]  %s46_s15, 2048, %s48_s19, [#allocation5], %s322_s9, %s322_s9, %s323_s10  }
   0xb   :  { %s62_s20 = sshll.u32 %s326_s0, 4  ;;  %s63_s20 = int_to_ptr.vmem [resolvable:$true] %s62_s20 }
   0xc   :  { %68 = dma.hbm_to_vmem [thread:$0]  %s61_s17, 2048, %s63_s20, [#allocation8], %s322_s9, %s322_s9, %s323_s10  }
   0xd   :  { %315 = dma.done.wait [#allocation3], 128  }
   0xe   :  { %316 = vsyncadd [#allocation3], 4294967168 }
   0xf   :  { %317 = dma.done.wait [#allocation5], 2304  }
  0x10   :  { %318 = vsyncadd [#allocation5], 4294964992 }
  0x11   :  { %319 = dma.done.wait [#allocation8], 2048  }
  0x12   :  { %320 = vsyncadd [#allocation8], 4294965248  ;;  %v89_v0 = vld [vmem:[#allocation4 + $0x8] sm:$0xff]  ;;  %v88_v1 = vld [vmem:[#allocation4] sm:$0xff]  ;;  %vm94_vm0 = vcmask 130048   ;;  %vm200_vm1 = vcmask 31744  }
  0x13   :  { %112 = vmatpush.msra.mxu0 %v89_v0  ;;  %v87_v2 = vld [vmem:[#allocation2] sm:$0xff]  ;;  %v134_v3 = vld [vmem:[#allocation6 + $0x78] sm:$0xff]  ;;  %v133_v4 = vld [vmem:[#allocation6 + $0x70] sm:$0xff] }
  0x14   :  { %139 = vmatpush.msra.mxu1 %v134_v3  ;;  %v132_v5 = vld [vmem:[#allocation6 + $0x68] sm:$0xff]  ;;  %v131_v6 = vld [vmem:[#allocation6 + $0x60] sm:$0xff]  ;;  %v130_v7 = vld [vmem:[#allocation6 + $0x58] sm:$0xff] }
  0x15   :  { %113 = vmatpush.msra.mxu0 %v88_v1  ;;  %v129_v8 = vld [vmem:[#allocation6 + $0x50] sm:$0xff]  ;;  %v128_v9 = vld [vmem:[#allocation6 + $0x48] sm:$0xff]  ;;  %v127_v10 = vld [vmem:[#allocation6 + $0x40] sm:$0xff] }
  0x16   :  { %209 = vmatmul.msk.f32.vlgmr.msra.gmra.mxu0 %vm94_vm0, %v87_v2  ;;  %140 = vmatpush.msra.mxu1 %v133_v4  ;;  %v126_v11 = vld [vmem:[#allocation6 + $0x38] sm:$0xff]  ;;  %v125_v12 = vld [vmem:[#allocation6 + $0x30] sm:$0xff]  ;;  %v124_v13 = vld [vmem:[#allocation6 + $0x28] sm:$0xff] }
  0x17   :  { %v123_v14 = vld [vmem:[#allocation6 + $0x20] sm:$0xff]  ;;  %v122_v15 = vld [vmem:[#allocation6 + $0x18] sm:$0xff]  ;;  %v121_v16 = vld [vmem:[#allocation6 + $0x10] sm:$0xff] }
  0x18   :  { %141 = vmatpush.msra.mxu1 %v132_v5  ;;  %v120_v17 = vld [vmem:[#allocation6 + $0x8] sm:$0xff]  ;;  %v119_v18 = vld [vmem:[#allocation6] sm:$0xff]  ;;  %v175_v19 = vld [vmem:[#allocation7 + $0x78] sm:$0xff] }
  0x19   :  { %v174_v20 = vld [vmem:[#allocation7 + $0x70] sm:$0xff]  ;;  %180 = vmatpush.msra.mxu2 %v175_v19  ;;  %v173_v21 = vld [vmem:[#allocation7 + $0x68] sm:$0xff]  ;;  %v172_v22 = vld [vmem:[#allocation7 + $0x60] sm:$0xff] }
  0x1a   :  { %142 = vmatpush.msra.mxu1 %v131_v6  ;;  %v171_v23 = vld [vmem:[#allocation7 + $0x58] sm:$0xff]  ;;  %v170_v24 = vld [vmem:[#allocation7 + $0x50] sm:$0xff]  ;;  %v169_v25 = vld [vmem:[#allocation7 + $0x48] sm:$0xff] }
  0x1b   :  { %181 = vmatpush.msra.mxu2 %v174_v20  ;;  %v168_v26 = vld [vmem:[#allocation7 + $0x40] sm:$0xff]  ;;  %v167_v27 = vld [vmem:[#allocation7 + $0x38] sm:$0xff]  ;;  %v166_v28 = vld [vmem:[#allocation7 + $0x30] sm:$0xff] }
  0x1c   :  { %143 = vmatpush.msra.mxu1 %v130_v7  ;;  %v165_v29 = vld [vmem:[#allocation7 + $0x28] sm:$0xff]  ;;  %v164_v30 = vld [vmem:[#allocation7 + $0x20] sm:$0xff]  ;;  %v163_v31 = vld [vmem:[#allocation7 + $0x18] sm:$0xff] }
  0x1d   :  { %182 = vmatpush.msra.mxu2 %v173_v21  ;;  %v216_v32 = vld [vmem:[%s393_s2] ss:$0 sm:$0xff]  ;;  %v162_v36 = vld [vmem:[#allocation7 + $0x10] sm:$0xff]  ;;  %v160_v38 = vld [vmem:[#allocation7] sm:$0xff] }
  0x1e   :  { %144 = vmatpush.msra.mxu1 %v129_v8  ;;  %v161_v37 = vld [vmem:[#allocation7 + $0x8] sm:$0xff] }
  0x1f   :  { %183 = vmatpush.msra.mxu2 %v172_v22  ;;  %v217_v39 = vld [vmem:[%s395_s4] ss:$0 sm:$0xff] }
  0x20   :  { %145 = vmatpush.msra.mxu1 %v128_v9  ;;  %v218_v43 = vld [vmem:[%s397_s6] ss:$0 sm:$0xff] }
  0x21   :  { %184 = vmatpush.msra.mxu2 %v171_v23 }
  0x22   :  { %146 = vmatpush.msra.mxu1 %v127_v10 }
  0x23   :  { %185 = vmatpush.msra.mxu2 %v170_v24 }
  0x24   :  { %147 = vmatpush.msra.mxu1 %v126_v11 }
  0x25   :  { %186 = vmatpush.msra.mxu2 %v169_v25 }
  0x26   :  { %148 = vmatpush.msra.mxu1 %v125_v12 }
  0x27   :  { %187 = vmatpush.msra.mxu2 %v168_v26 }
  0x28   :  { %149 = vmatpush.msra.mxu1 %v124_v13 }
  0x29   :  { %188 = vmatpush.msra.mxu2 %v167_v27 }
  0x2a   :  { %150 = vmatpush.msra.mxu1 %v123_v14 }
  0x2b   :  { %189 = vmatpush.msra.mxu2 %v166_v28 }
  0x2c   :  { %151 = vmatpush.msra.mxu1 %v122_v15 }
  0x2d   :  { %190 = vmatpush.msra.mxu2 %v165_v29 }
  0x2e   :  { %152 = vmatpush.msra.mxu1 %v121_v16 }
  0x2f   :  { %191 = vmatpush.msra.mxu2 %v164_v30 }
  0x30   :  { %153 = vmatpush.msra.mxu1 %v120_v17 }
  0x31   :  { %192 = vmatpush.msra.mxu2 %v163_v31 }
  0x32   :  { %154 = vmatpush.msra.mxu1 %v119_v18 }
  0x33   :  { %193 = vmatpush.msra.mxu2 %v162_v36 }
  0x35   :  { %194 = vmatpush.msra.mxu2 %v161_v37 }
  0x37   :  { %195 = vmatpush.msra.mxu2 %v160_v38 }
  0x93   :  { %v115_v33 = vpop.f32.mrf.mxu0 }
  0x94   :  { %v116_v34 = vadd.f32 %v216_v32, %v115_v33 }
  0x96   :  { %v118_v35 = vmax.f32 %v116_v34, 0.0 }
  0x98   :  { %155 = vmatmul.f32.vlgmr.msra.gmra.mxu1 %v118_v35 }
 0x115   :  { %v156_v40 = vpop.f32.mrf.mxu1 }
 0x116   :  { %v157_v41 = vadd.f32 %v217_v39, %v156_v40 }
 0x118   :  { %v159_v42 = vmax.f32 %v157_v41, 0.0 }
 0x11a   :  { %196 = vmatmul.f32.vlgmr.msra.gmra.mxu2 %v159_v42 }
 0x19d   :  { %v197_v44 = vpop.f32.mrf.mxu2 }
 0x19e   :  { %v198_v45 = vadd.f32 %v218_v43, %v197_v44 }
 0x1a0   :  { %201 = vst.msk [vmem:[%s398_s7] sm:$0xff] %vm200_vm1, %v198_v45 }
 0x1a1   :  { %206 = vsyncpa [#allocation3], 1 }
 0x1a2   :  { %207 = vsyncpa [#allocation5], 1 }
 0x1a3   :  { %208 = vsyncpa [#allocation8], 1 }

</bundles_post_ra>
